<compile_context>
chip_gen: v5e
topology: v5e:2x2
jax: 0.10.0
libtpu: 0.0.40
codegen_flags: <defaults>
</compile_context>

<pallas_src>
import functools

import jax
import jax.numpy as jnp
import numpy as np
from jax.experimental import pallas as pl
from jax.experimental.pallas import tpu as pltpu


def _round_up(x, m):
    return (x + m - 1) // m * m


def _vmem_capacity_bytes():
    """Physical VMEM of the current TPU generation (fallback 64 MiB ~= v7x/TC)."""
    try:
        cap = getattr(pltpu.get_tpu_info(), "vmem_capacity_bytes", None)
        if cap:
            return int(cap)
    except Exception:
        pass
    return 64 * 1024 * 1024


def _choose_spatial_tile(C, S, itemsize, vmem_cap):
    """Pick a lane tile TS (multiple of 128) from a VMEM-byte budget.

    The budget counts the double-buffered input tiles and ~4 f32 intermediate
    copies created in the kernel body (casts, exp, products), so the result is
    safe on 64 MiB (v7x) and 128 MiB (v5e/v6e) parts alike.
    """
    c_pad = _round_up(max(int(C), 1), 8)                  # sublane padding
    # bytes per lane of TS:
    #   inputs:        2 tensors x 2 pipeline buffers x c_pad x itemsize
    #   intermediates: ~4 f32 copies x c_pad x 4
    per_lane = 4 * c_pad * itemsize + 4 * c_pad * 4
    budget = vmem_cap // 2                                # headroom for compiler
    ts = (budget // per_lane) // 128 * 128
    ts = max(ts, 128)
    ts = min(ts, 128 * 1024)                              # sanity cap (multi-MiB/step)
    ts = min(ts, _round_up(max(int(S), 1), 128))          # don't exceed the extent
    return int(ts)


def _dice_kernel(w_ref, p_ref, t_ref, loss_ref, num_acc, den_acc, *,
                 smooth, apply_softmax, ts, s_valid, has_tail):
    """Per-(batch, spatial-tile) Dice accumulation.

    w_ref:    (C, 1)      class weights (VMEM, constant block -> DMA'd once)
    p_ref:    (1, C, TS)  predict tile (VMEM)
    t_ref:    (1, C, TS)  target tile  (VMEM)
    loss_ref: (1, 1, 128) per-batch loss block (VMEM, resident across s)
    num_acc:  (C, 1)      per-class numerator accumulator (VMEM scratch)
    den_acc:  (C, 1)      per-class denominator accumulator (VMEM scratch)
    """
    s = pl.program_id(1)
    last = pl.num_programs(1) - 1

    @pl.when(s == 0)
    def _init():
        num_acc[...] = jnp.zeros_like(num_acc)
        den_acc[...] = jnp.zeros_like(den_acc)

    p = p_ref[0].astype(jnp.float32)   # (C, TS)
    t = t_ref[0].astype(jnp.float32)   # (C, TS)

    if apply_softmax:
        # softmax over the channel axis (== F.softmax(dim=1) on NCHW input)
        m = jnp.max(p, axis=0, keepdims=True)             # (1, TS)
        e = jnp.exp(p - m)                                 # (C, TS)
        z = jnp.sum(e, axis=0, keepdims=True)              # (1, TS)
        p = e * pl.reciprocal(z, approx=False)             # one recip/col (EUP)

    def _accumulate(pv, tv):
        # Reductions over the flattened spatial axis (dim=2 in the PyTorch code).
        num_acc[...] += jnp.sum(pv * tv, axis=1, keepdims=True)               # (C, 1)
        den_acc[...] += (jnp.sum(pv, axis=1, keepdims=True)
                         + jnp.sum(tv, axis=1, keepdims=True))                # (C, 1)

    if has_tail:
        # Full tiles: mask-free accumulation (no per-element iota/compare/select).
        @pl.when(s < last)
        def _full():
            _accumulate(p, t)

        # Tail tile: columns >= S hold unspecified (garbage) data from the
        # partially-filled VMEM block -> mask BOTH p and t before the products.
        @pl.when(s == last)
        def _tail():
            valid = s_valid - s * ts
            col = jax.lax.broadcasted_iota(jnp.int32, p.shape, 1)
            keep = col < valid
            _accumulate(jnp.where(keep, p, 0.0), jnp.where(keep, t, 0.0))
    else:
        _accumulate(p, t)

    @pl.when(s == last)
    def _finalize():
        w = w_ref[...]                                                         # (C, 1)
        num_s = jnp.sum(w * num_acc[...], keepdims=True)                       # (1, 1)
        den_s = jnp.sum(w * den_acc[...], keepdims=True)                       # (1, 1)
        loss = 1.0 - 2.0 * num_s / (den_s + smooth)                            # (1, 1)
        loss_ref[0] = jnp.broadcast_to(loss, (1, 128))


def dice_loss(predict, target, weight=None, ignore_index=None,
              smooth=1.0, reduction="mean", softmax=True, spatial_tile=None):
    assert predict.shape == target.shape, (
        f"predict & target shape do not match. {predict.shape} != {target.shape}")
    assert reduction in ("mean", "sum", "none")

    N, C = int(predict.shape[0]), int(predict.shape[1])
    S = int(np.prod(predict.shape[2:])) if predict.ndim > 2 else 1

    p = predict.reshape(N, C, S)
    t = target.reshape(N, C, S)

    itemsize = max(p.dtype.itemsize, t.dtype.itemsize)
    vmem_cap = _vmem_capacity_bytes()
    if spatial_tile is None:
        TS = _choose_spatial_tile(C, S, itemsize, vmem_cap)
    else:
        TS = max(128, _round_up(int(spatial_tile), 128))
    n_s = (S + TS - 1) // TS
    has_tail = (S % TS) != 0

    if weight is None:
        w = jnp.ones((C, 1), jnp.float32)
    else:
        w = jnp.asarray(weight, jnp.float32).reshape(C, 1)
        if ignore_index is not None:
            w = w.at[ignore_index, 0].set(0.0)

    kernel = functools.partial(
        _dice_kernel,
        smooth=float(smooth),
        apply_softmax=bool(softmax),
        ts=TS,
        s_valid=S,
        has_tail=has_tail)

    elems = N * C * S
    cost = pl.CostEstimate(
        flops=10 * elems,
        transcendentals=elems if softmax else 0,
        bytes_accessed=int(p.size * p.dtype.itemsize
                           + t.size * t.dtype.itemsize
                           + C * 4 + N * 128 * 4))

    vmem_limit = min(int(vmem_cap * 3 // 4), 112 * 1024 * 1024)

    out = pl.pallas_call(
        kernel,
        out_shape=jax.ShapeDtypeStruct((N, 1, 128), jnp.float32),
        grid_spec=pltpu.PrefetchScalarGridSpec(
            num_scalar_prefetch=0,
            grid=(N, n_s),
            in_specs=[
                pl.BlockSpec((C, 1), lambda n, s: (0, 0)),         # class weights
                pl.BlockSpec((1, C, TS), lambda n, s: (n, 0, s)),  # predict tile
                pl.BlockSpec((1, C, TS), lambda n, s: (n, 0, s)),  # target tile
            ],
            out_specs=pl.BlockSpec((1, 1, 128), lambda n, s: (n, 0, 0)),
            scratch_shapes=[pltpu.VMEM((C, 1), jnp.float32),
                            pltpu.VMEM((C, 1), jnp.float32)],
        ),
        compiler_params=pltpu.CompilerParams(
            dimension_semantics=("parallel", "arbitrary"),
            vmem_limit_bytes=vmem_limit),
        cost_estimate=cost,
    )(w, p, t)

    losses = out[:, 0, 0]                                          # (N,)

    if reduction == "mean":
        return losses.mean()
    elif reduction == "sum":
        return losses.sum()
    return losses


def _dice_loss_ref(predict, target, weight=None, ignore_index=None,
                   smooth=1.0, reduction="mean", softmax=True):
    """Pure-JAX reference mirroring the PyTorch forward."""
    N, C = predict.shape[0], predict.shape[1]
    p = predict.reshape(N, C, -1).astype(jnp.float32)
    t = target.reshape(N, C, -1).astype(jnp.float32)
    if softmax:
        p = jax.nn.softmax(p, axis=1)
    num = jnp.sum(p * t, axis=2)
    den = jnp.sum(p + t, axis=2)
    if weight is not None:
        w = jnp.asarray(weight, jnp.float32)
        if ignore_index is not None:
            w = w.at[ignore_index].set(0.0)
        num = w[None, :] * num
        den = w[None, :] * den
    num = num.sum(1)
    den = den.sum(1)
    total = 1.0 - 2.0 * num / (den + smooth)
    if reduction == "mean":
        return total.mean()
    elif reduction == "sum":
        return total.sum()
    return total


if __name__ == "__main__":
    key = jax.random.PRNGKey(0)
    k1, k2 = jax.random.split(key)

    # S = 16*18 = 288 is NOT a multiple of 128, so the in-kernel ragged-tail
    # masking path is exercised (no wrapper-side padding exists anymore).
    N, C, H, W = 2, 4, 16, 18
    predict = jax.random.normal(k1, (N, C, H, W), dtype=jnp.float32)
    labels = jax.random.randint(k2, (N, H, W), 0, C)
    target = jax.nn.one_hot(labels, C, axis=1, dtype=jnp.float32)   # (N, C, H, W)

    # Test 1: mean reduction, forced small spatial tile -> multi-tile
    # accumulation (2 full tiles) + masked tail tile.
    out = dice_loss(predict, target, smooth=1.0, reduction="mean",
                    softmax=True, spatial_tile=128)
    out = jax.block_until_ready(out)
    ref = _dice_loss_ref(predict, target, smooth=1.0, reduction="mean",
                         softmax=True)
    np.testing.assert_allclose(np.asarray(out), np.asarray(ref),
                               rtol=1e-5, atol=1e-5)

    # Test 2: class weights + ignore_index, 'none' reduction, auto (large)
    # tile size -> single partial tile, masked in-kernel.
    wts = jnp.asarray([0.5, 1.0, 2.0, 1.5], jnp.float32)
    out2 = dice_loss(predict, target, weight=wts, ignore_index=2,
                     smooth=1.0, reduction="none", softmax=True)
    out2 = jax.block_until_ready(out2)
    ref2 = _dice_loss_ref(predict, target, weight=wts, ignore_index=2,
                          smooth=1.0, reduction="none", softmax=True)
    np.testing.assert_allclose(np.asarray(out2), np.asarray(ref2),
                               rtol=1e-5, atol=1e-5)

    # Test 3: spatial size an exact multiple of the tile -> mask-free path.
    predict3 = jax.random.normal(k1, (2, 4, 16, 16), dtype=jnp.float32)
    labels3 = jax.random.randint(k2, (2, 16, 16), 0, 4)
    target3 = jax.nn.one_hot(labels3, 4, axis=1, dtype=jnp.float32)
    out3 = dice_loss(predict3, target3, smooth=1.0, reduction="sum",
                     softmax=True, spatial_tile=128)
    out3 = jax.block_until_ready(out3)
    ref3 = _dice_loss_ref(predict3, target3, smooth=1.0, reduction="sum",
                          softmax=True)
    np.testing.assert_allclose(np.asarray(out3), np.asarray(ref3),
                               rtol=1e-5, atol=1e-5)

    print("KERNEL_OK")
</pallas_src>

<mosaic_0001>
module attributes {stable_mosaic.version = 11 : i64} {
  func.func @_dice_kernel(%arg0: i32, %arg1: i32, %arg2: memref<4x1xf32, #tpu.memory_space<vmem>>, %arg3: memref<1x4x128xf32, #tpu.memory_space<vmem>>, %arg4: memref<1x4x128xf32, #tpu.memory_space<vmem>>, %arg5: memref<1x1x128xf32, #tpu.memory_space<vmem>>, %arg6: memref<4x1xf32, #tpu.memory_space<vmem>>, %arg7: memref<4x1xf32, #tpu.memory_space<vmem>>) attributes {dimension_semantics = [#tpu.dimension_semantics<parallel>, #tpu.dimension_semantics<arbitrary>], iteration_bounds = array<i64: 2, 3>, scalar_prefetch = 0 : i64, scratch_operands = 2 : i64, tpu.core_type = #tpu.core_type<tc>, window_params = [{pipeline_mode = #tpu.pipeline_mode<synchronous>, transform_indices = @transform_0, window_bounds = array<i64: 4, 1>}, {transform_indices = @transform_1, window_bounds = array<i64: 1, 4, 128>}, {transform_indices = @transform_2, window_bounds = array<i64: 1, 4, 128>}, {transform_indices = @transform_3, window_bounds = array<i64: 1, 1, 128>}]} {
    %c0_i32 = arith.constant 0 : i32
    %0 = arith.cmpi eq, %arg1, %c0_i32 : i32
    %1 = arith.extui %0 : i1 to i32
    %c0_i32_0 = arith.constant 0 : i32
    %2 = arith.cmpi ne, %1, %c0_i32_0 : i32
    scf.if %2 {
      %cst_12 = arith.constant 0.000000e+00 : f32
      %26 = vector.broadcast %cst_12 : f32 to vector<4x1xf32>
      %c0_13 = arith.constant 0 : index
      %c0_14 = arith.constant 0 : index
      %27 = vector.load %arg6[%c0_13, %c0_14] : memref<4x1xf32, #tpu.memory_space<vmem>>, vector<4x1xf32>
      tpu.vector_store %arg6[%c0_13, %c0_14], %26 {strides = array<i32>} : memref<4x1xf32, #tpu.memory_space<vmem>>, vector<4x1xf32>,
      %cst_15 = arith.constant 0.000000e+00 : f32
      %28 = vector.broadcast %cst_15 : f32 to vector<4x1xf32>
      %c0_16 = arith.constant 0 : index
      %c0_17 = arith.constant 0 : index
      %29 = vector.load %arg7[%c0_16, %c0_17] : memref<4x1xf32, #tpu.memory_space<vmem>>, vector<4x1xf32>
      tpu.vector_store %arg7[%c0_16, %c0_17], %28 {strides = array<i32>} : memref<4x1xf32, #tpu.memory_space<vmem>>, vector<4x1xf32>,
    } else {
    }
    %c0 = arith.constant 0 : index
    %c0_1 = arith.constant 0 : index
    %c0_2 = arith.constant 0 : index
    %3 = vector.load %arg3[%c0, %c0_1, %c0_2] : memref<1x4x128xf32, #tpu.memory_space<vmem>>, vector<1x4x128xf32>
    %4 = vector.shape_cast %3 : vector<1x4x128xf32> to vector<4x128xf32>
    %c0_3 = arith.constant 0 : index
    %c0_4 = arith.constant 0 : index
    %c0_5 = arith.constant 0 : index
    %5 = vector.load %arg4[%c0_3, %c0_4, %c0_5] : memref<1x4x128xf32, #tpu.memory_space<vmem>>, vector<1x4x128xf32>
    %6 = vector.shape_cast %5 : vector<1x4x128xf32> to vector<4x128xf32>
    %cst = arith.constant dense<0xFF800000> : vector<128xf32>
    %7 = vector.multi_reduction <maximumf>, %4, %cst [0] : vector<4x128xf32> to vector<128xf32>
    %8 = vector.shape_cast %7 : vector<128xf32> to vector<1x128xf32>
    %9 = vector.broadcast %8 : vector<1x128xf32> to vector<4x128xf32>
    %10 = arith.subf %4, %9 : vector<4x128xf32>
    %11 = math.exp %10 : vector<4x128xf32>
    %cst_6 = arith.constant dense<0.000000e+00> : vector<128xf32>
    %12 = vector.multi_reduction <add>, %11, %cst_6 [0] : vector<4x128xf32> to vector<128xf32>
    %13 = vector.shape_cast %12 : vector<128xf32> to vector<1x128xf32>
    %14 = tpu.reciprocal %13 : vector<1x128xf32> -> vector<1x128xf32>
    %15 = vector.broadcast %14 : vector<1x128xf32> to vector<4x128xf32>
    %16 = arith.mulf %11, %15 : vector<4x128xf32>
    %c2_i32 = arith.constant 2 : i32
    %17 = arith.cmpi slt, %arg1, %c2_i32 : i32
    %18 = arith.extui %17 : i1 to i32
    %c0_i32_7 = arith.constant 0 : i32
    %19 = arith.cmpi ne, %18, %c0_i32_7 : i32
    scf.if %19 {
      %c0_12 = arith.constant 0 : index
      %c0_13 = arith.constant 0 : index
      %26 = vector.load %arg6[%c0_12, %c0_13] : memref<4x1xf32, #tpu.memory_space<vmem>>, vector<4x1xf32>
      %27 = arith.mulf %16, %6 : vector<4x128xf32>
      %cst_14 = arith.constant dense<0.000000e+00> : vector<4xf32>
      %28 = vector.multi_reduction <add>, %27, %cst_14 [1] : vector<4x128xf32> to vector<4xf32>
      %29 = vector.shape_cast %28 : vector<4xf32> to vector<4x1xf32>
      %30 = arith.addf %26, %29 : vector<4x1xf32>
      %c0_15 = arith.constant 0 : index
      %c0_16 = arith.constant 0 : index
      %31 = vector.load %arg6[%c0_15, %c0_16] : memref<4x1xf32, #tpu.memory_space<vmem>>, vector<4x1xf32>
      tpu.vector_store %arg6[%c0_15, %c0_16], %30 {strides = array<i32>} : memref<4x1xf32, #tpu.memory_space<vmem>>, vector<4x1xf32>,
      %c0_17 = arith.constant 0 : index
      %c0_18 = arith.constant 0 : index
      %32 = vector.load %arg7[%c0_17, %c0_18] : memref<4x1xf32, #tpu.memory_space<vmem>>, vector<4x1xf32>
      %cst_19 = arith.constant dense<0.000000e+00> : vector<4xf32>
      %33 = vector.multi_reduction <add>, %16, %cst_19 [1] : vector<4x128xf32> to vector<4xf32>
      %34 = vector.shape_cast %33 : vector<4xf32> to vector<4x1xf32>
      %cst_20 = arith.constant dense<0.000000e+00> : vector<4xf32>
      %35 = vector.multi_reduction <add>, %6, %cst_20 [1] : vector<4x128xf32> to vector<4xf32>
      %36 = vector.shape_cast %35 : vector<4xf32> to vector<4x1xf32>
      %37 = arith.addf %34, %36 : vector<4x1xf32>
      %38 = arith.addf %32, %37 : vector<4x1xf32>
      %c0_21 = arith.constant 0 : index
      %c0_22 = arith.constant 0 : index
      %39 = vector.load %arg7[%c0_21, %c0_22] : memref<4x1xf32, #tpu.memory_space<vmem>>, vector<4x1xf32>
      tpu.vector_store %arg7[%c0_21, %c0_22], %38 {strides = array<i32>} : memref<4x1xf32, #tpu.memory_space<vmem>>, vector<4x1xf32>,
    } else {
    }
    %c2_i32_8 = arith.constant 2 : i32
    %20 = arith.cmpi eq, %arg1, %c2_i32_8 : i32
    %21 = arith.extui %20 : i1 to i32
    %c0_i32_9 = arith.constant 0 : i32
    %22 = arith.cmpi ne, %21, %c0_i32_9 : i32
    scf.if %22 {
      %c128_i32 = arith.constant 128 : i32
      %26 = arith.muli %arg1, %c128_i32 : i32
      %c288_i32 = arith.constant 288 : i32
      %27 = arith.subi %c288_i32, %26 : i32
      %28 = tpu.iota {dimensions = array<i32: 1>} : vector<4x128xi32>
      %29 = vector.broadcast %27 : i32 to vector<4x128xi32>
      %30 = arith.cmpi slt, %28, %29 : vector<4x128xi32>
      %cst_12 = arith.constant 0.000000e+00 : f32
      %31 = vector.broadcast %cst_12 : f32 to vector<4x128xf32>
      %32 = arith.select %30, %16, %31 : vector<4x128xi1>, vector<4x128xf32>
      %cst_13 = arith.constant 0.000000e+00 : f32
      %33 = vector.broadcast %cst_13 : f32 to vector<4x128xf32>
      %34 = arith.select %30, %6, %33 : vector<4x128xi1>, vector<4x128xf32>
      %c0_14 = arith.constant 0 : index
      %c0_15 = arith.constant 0 : index
      %35 = vector.load %arg6[%c0_14, %c0_15] : memref<4x1xf32, #tpu.memory_space<vmem>>, vector<4x1xf32>
      %36 = arith.mulf %32, %34 : vector<4x128xf32>
      %cst_16 = arith.constant dense<0.000000e+00> : vector<4xf32>
      %37 = vector.multi_reduction <add>, %36, %cst_16 [1] : vector<4x128xf32> to vector<4xf32>
      %38 = vector.shape_cast %37 : vector<4xf32> to vector<4x1xf32>
      %39 = arith.addf %35, %38 : vector<4x1xf32>
      %c0_17 = arith.constant 0 : index
      %c0_18 = arith.constant 0 : index
      %40 = vector.load %arg6[%c0_17, %c0_18] : memref<4x1xf32, #tpu.memory_space<vmem>>, vector<4x1xf32>
      tpu.vector_store %arg6[%c0_17, %c0_18], %39 {strides = array<i32>} : memref<4x1xf32, #tpu.memory_space<vmem>>, vector<4x1xf32>,
      %c0_19 = arith.constant 0 : index
      %c0_20 = arith.constant 0 : index
      %41 = vector.load %arg7[%c0_19, %c0_20] : memref<4x1xf32, #tpu.memory_space<vmem>>, vector<4x1xf32>
      %cst_21 = arith.constant dense<0.000000e+00> : vector<4xf32>
      %42 = vector.multi_reduction <add>, %32, %cst_21 [1] : vector<4x128xf32> to vector<4xf32>
      %43 = vector.shape_cast %42 : vector<4xf32> to vector<4x1xf32>
      %cst_22 = arith.constant dense<0.000000e+00> : vector<4xf32>
      %44 = vector.multi_reduction <add>, %34, %cst_22 [1] : vector<4x128xf32> to vector<4xf32>
      %45 = vector.shape_cast %44 : vector<4xf32> to vector<4x1xf32>
      %46 = arith.addf %43, %45 : vector<4x1xf32>
      %47 = arith.addf %41, %46 : vector<4x1xf32>
      %c0_23 = arith.constant 0 : index
      %c0_24 = arith.constant 0 : index
      %48 = vector.load %arg7[%c0_23, %c0_24] : memref<4x1xf32, #tpu.memory_space<vmem>>, vector<4x1xf32>
      tpu.vector_store %arg7[%c0_23, %c0_24], %47 {strides = array<i32>} : memref<4x1xf32, #tpu.memory_space<vmem>>, vector<4x1xf32>,
    } else {
    }
    %c2_i32_10 = arith.constant 2 : i32
    %23 = arith.cmpi eq, %arg1, %c2_i32_10 : i32
    %24 = arith.extui %23 : i1 to i32
    %c0_i32_11 = arith.constant 0 : i32
    %25 = arith.cmpi ne, %24, %c0_i32_11 : i32
    scf.if %25 {
      %c0_12 = arith.constant 0 : index
      %c0_13 = arith.constant 0 : index
      %26 = vector.load %arg2[%c0_12, %c0_13] : memref<4x1xf32, #tpu.memory_space<vmem>>, vector<4x1xf32>
      %c0_14 = arith.constant 0 : index
      %c0_15 = arith.constant 0 : index
      %27 = vector.load %arg6[%c0_14, %c0_15] : memref<4x1xf32, #tpu.memory_space<vmem>>, vector<4x1xf32>
      %28 = arith.mulf %26, %27 : vector<4x1xf32>
      %29 = vector.shape_cast %28 : vector<4x1xf32> to vector<1x4x1xf32>
      %cst_16 = arith.constant dense<0.000000e+00> : vector<1xf32>
      %30 = vector.multi_reduction <add>, %29, %cst_16 [1, 2] : vector<1x4x1xf32> to vector<1xf32>
      %31 = vector.shape_cast %30 : vector<1xf32> to vector<1x1x1xf32>
      %32 = vector.extract %31[0, 0, 0] : f32 from vector<1x1x1xf32>
      %33 = vector.broadcast %32 : f32 to vector<1x1xf32>
      %c0_17 = arith.constant 0 : index
      %c0_18 = arith.constant 0 : index
      %34 = vector.load %arg7[%c0_17, %c0_18] : memref<4x1xf32, #tpu.memory_space<vmem>>, vector<4x1xf32>
      %35 = arith.mulf %26, %34 : vector<4x1xf32>
      %36 = vector.shape_cast %35 : vector<4x1xf32> to vector<1x4x1xf32>
      %cst_19 = arith.constant dense<0.000000e+00> : vector<1xf32>
      %37 = vector.multi_reduction <add>, %36, %cst_19 [1, 2] : vector<1x4x1xf32> to vector<1xf32>
      %38 = vector.shape_cast %37 : vector<1xf32> to vector<1x1x1xf32>
      %39 = vector.extract %38[0, 0, 0] : f32 from vector<1x1x1xf32>
      %40 = vector.broadcast %39 : f32 to vector<1x1xf32>
      %cst_20 = arith.constant 2.000000e+00 : f32
      %41 = vector.broadcast %cst_20 : f32 to vector<1x1xf32>
      %42 = arith.mulf %41, %33 : vector<1x1xf32>
      %cst_21 = arith.constant 1.000000e+00 : f32
      %43 = vector.broadcast %cst_21 : f32 to vector<1x1xf32>
      %44 = arith.addf %40, %43 : vector<1x1xf32>
      %45 = arith.divf %42, %44 : vector<1x1xf32>
      %cst_22 = arith.constant 1.000000e+00 : f32
      %46 = vector.broadcast %cst_22 : f32 to vector<1x1xf32>
      %47 = arith.subf %46, %45 : vector<1x1xf32>
      %48 = vector.shape_cast %47 : vector<1x1xf32> to vector<1x1xf32>
      %49 = vector.broadcast %48 : vector<1x1xf32> to vector<1x128xf32>
      %c0_23 = arith.constant 0 : index
      %c0_24 = arith.constant 0 : index
      %c0_25 = arith.constant 0 : index
      %50 = vector.load %arg5[%c0_23, %c0_24, %c0_25] : memref<1x1x128xf32, #tpu.memory_space<vmem>>, vector<1x1x128xf32>
      %51 = vector.shape_cast %50 : vector<1x1x128xf32> to vector<1x128xf32>
      %52 = vector.shape_cast %49 : vector<1x128xf32> to vector<1x1x128xf32>
      tpu.vector_store %arg5[%c0_23, %c0_24, %c0_25], %52 {strides = array<i32>} : memref<1x1x128xf32, #tpu.memory_space<vmem>>, vector<1x1x128xf32>,
    } else {
    }
    return
  }
  func.func @transform_0(%arg0: i32, %arg1: i32) -> (i32, i32) {
    %c0_i32 = arith.constant 0 : i32
    %c0_i32_0 = arith.constant 0 : i32
    %c0_i32_1 = arith.constant 0 : i32
    return %c0_i32, %c0_i32_0 : i32, i32
  }
  func.func @transform_1(%arg0: i32, %arg1: i32) -> (i32, i32, i32) {
    %c0_i32 = arith.constant 0 : i32
    %c0_i32_0 = arith.constant 0 : i32
    return %arg0, %c0_i32, %arg1 : i32, i32, i32
  }
  func.func @transform_2(%arg0: i32, %arg1: i32) -> (i32, i32, i32) {
    %c0_i32 = arith.constant 0 : i32
    %c0_i32_0 = arith.constant 0 : i32
    return %arg0, %c0_i32, %arg1 : i32, i32, i32
  }
  func.func @transform_3(%arg0: i32, %arg1: i32) -> (i32, i32, i32) {
    %c0_i32 = arith.constant 0 : i32
    %c0_i32_0 = arith.constant 0 : i32
    %c0_i32_1 = arith.constant 0 : i32
    return %arg0, %c0_i32, %c0_i32_0 : i32, i32, i32
  }
}

</mosaic_0001>

<bundles_post_ra>
// kernel: tpu_custom_call.1
= control target key start
LH: loop header
LB: loop body
LE: loop exit
PB: predicated region body
PF: predicated region fallthrough
CT: control target
= control target key end

     0   :  { %s1062_s0 = inlined_call_operand.vmem [shape: f32[4,1], index: 0, kind: input, shape index: {}]   ;;  %s1063_s1 = inlined_call_operand.hbm [shape: f32[2,4,288], index: 1, kind: input, shape index: {}]   ;;  %s1064_s2 = inlined_call_operand.hbm [shape: f32[2,4,288], index: 2, kind: input, shape index: {}]   ;;  %s1065_s3 = inlined_call_operand.hbm [shape: f32[2,1,128], index: 3, kind: output, shape index: {}]  }
   0x1   :  { %1071 = sst [smem:[#allocation19_spill]] %s1063_s1 }
   0x2   :  { %8 = vsyncpa [#allocation5], 0 }
   0x3   :  { %10 = vsyncpa [#allocation5 + $0x1], 0 }
   0x4   :  { %11 = vsyncpa [#allocation8], 0 }
   0x5   :  { %13 = vsyncpa [#allocation8 + $0x1], 0 }
   0x6   :  { %14 = vsyncpa [#allocation6], 0 }
   0x7   :  { %16 = vsyncpa [#allocation6 + $0x1], 0  ;;  %s849_s12 = smov 0   ;;  %s851_s13 = smov 0  }
   0x8   :  { %s853_s14 = smov 0   ;;  %s855_s15 = smov 0  }
   0x9   :  { %s857_s16 = smov 0   ;;  %s859_s17 = smov 0  }
   0xa   :  { %s861_s18 = smov 0   ;;  %s863_s19 = smov 0  }
   0xb   :  { %s865_s20 = smov 0   ;;  %s867_s21 = smov 0  }
   0xc   :  { %s869_s22 = smov 0  }
   0xd LB: > { %1072 = sst [smem:[#allocation13_spill]] %s806_s17  ;;  %s503_s23 = sadd.s32 4294967295, %s826_s22   ;;  %s826_s22 = sphi %s869_s22, %s22_s22   ;;  %s822_s21 = sphi %s867_s21, %s1089_s21   ;;  %s818_s20 = sphi %s865_s20, %s1088_s20   ;;  %s814_s19 = sphi %s863_s19, %s1087_s19   ;;  %s810_s18 = sphi %s861_s18, %s1086_s18   ;;  %s806_s17 = sphi %s859_s17, %s1085_s17   ;;  %s802_s16 = sphi %s857_s16, %s1094_s16   ;;  %s798_s15 = sphi %s855_s15, %s1093_s15   ;;  %s794_s14 = sphi %s853_s14, %s1092_s14   ;;  %s790_s13 = sphi %s851_s13, %s1091_s13   ;;  %s786_s12 = sphi %s849_s12, %s1090_s12  }
   0xe   : > { %1073 = sst [smem:[#allocation14_spill]] %s818_s20  ;;  %s504_s24 = sadd.s32 4294967294, %s826_s22  }
   0xf   : > { %1074 = sst [smem:[#allocation15_spill]] %s822_s21  ;;  %s31_s25 = sadd.s32 1, %s818_s20 }
  0x10   : > { %s34_s26 = sadd.s32 1, %s822_s21  ;;  %p32_p0 = scmp.ge.s32.totalorder %s31_s25, 3 }
  0x11   : > { %s64_s27 = sadd.s32 1, %s806_s17  ;;  %p71_p1 = scmp.ne.s32.totalorder %s806_s17, %s802_s16 }
  0x12   : > { %p72_p2 = scmp.eq.s32.totalorder %s826_s22, 0  ;;  %s1096_s25 = smov (%p32_p0, %s31_s25), 0 }
  0x13   : > { %1075 = sst [smem:[#allocation16_spill]] %s1096_s25  ;;  %s1098_s26 = smov (!%p32_p0, %s34_s26), %s822_s21 }
  0x14   : > { %s60_s28 = ssub.s32 %s818_s20, %s1096_s25  ;;  %p915_p3 = por %p72_p2, %p71_p1 }
  0x15   : > { %p36_p4 = scmp.ge.s32.totalorder %s1098_s26, 2  ;;  %p77_p5 = scmp.ne.s32.totalorder %s802_s16, %s798_s15 }
  0x16   : > { %p78_p6 = scmp.eq.s32.totalorder %s503_s23, 0  ;;  %s118_s30 = sadd.s32 1, %s794_s14 }
  0x17   : > { %s1100_s26 = smov (%p36_p4, %s1098_s26), 0  ;;  %p128_p8 = scmp.ne.s32.totalorder %s794_s14, %s790_s13 }
  0x18   : > { %1077 = sst [smem:[#allocation17_spill]] %s1100_s26  ;;  %p923_p7 = por %p78_p6, %p77_p5 }
  0x19   : > { %s59_s5 = ssub.s32 %s822_s21, %s1100_s26  ;;  %p129_p9 = scmp.eq.s32.totalorder %s503_s23, 5 }
  0x1a   : > { %s61_s6 = sor.u32 %s60_s28, %s59_s5  ;;  %p116_p10 = scmp.eq.s32.totalorder %s59_s5, 0 }
  0x1b   : > { %p62_p11 = scmp.eq.s32.totalorder %s61_s6, 0  ;;  %p931_p12 = por %p129_p9, %p128_p8 }
  0x1c   : > { %s936_s8 = scalar_select %p116_p10, %s794_s14, %s118_s30  }
  0x1d   : > { %s939_s9 = scalar_select %p62_p11, %s806_s17, %s64_s27  }
  0x1e   : > { %p134_p13 = scmp.ne.s32.totalorder %s790_s13, %s786_s12  ;;  %p135_p0 = scmp.eq.s32.totalorder %s504_s24, 5 }
  0x1f   : > { %1080 = sst [smem:[#allocation18_spill]] %s939_s9  ;;  %p543_p1 = scmp.lt.s32.totalorder %s826_s22, 6 }
  0x20   : > { %p944_p2 = por %p135_p0, %p134_p13  ;;  %s158_s11 = sand.u32 1, %s806_s17  }
  0x21   : > { %s507_s15 = sshll.u32 %s158_s11, 2  ;;  %s520_s23 = smul.u32 3, %s822_s21 }
  0x22   : > { %s162_s28 = scalar_lea.vmem [#allocation4], %s507_s15  ;;  %p952_p4 = pnand %p543_p1, %p915_p3 }
  0x23   : > { %s172_s5 = sshll.u32 %s162_s28, 4  ;;  %s166_s27 = sadd.s32 %s818_s20, %s520_s23  ;;  %s173_s5 = int_to_ptr.vmem [resolvable:$true] %s172_s5 }
  0x24   : > { %s508_s6 = sshll.u32 %s166_s27, 2  ;;  %s1083_s1 = sld [smem:[#allocation19_spill]] }
  0x25   : > { %p511_p5 = scmp.ge.s32.totalorder %s826_s22, 1  ;;  %p198_p6 = scmp.lt.s32.totalorder %s826_s22, 7 }
  0x26   : > { %s159_s21 = scalar_lea.sflag [#allocation5], %s158_s11  ;;  %s189_s17 = scalar_lea.hbm %s1064_s2, %s508_s6 }
  0x27   : > { %p199_p3 = pnand %p511_p5, %p198_p6  ;;  %s183_s23 = scalar_lea.vmem [#allocation7], %s507_s15 }
  0x28   : > { %s193_s20 = sshll.u32 %s183_s23, 4  ;;  %s191_s27 = sshll.u32 %s189_s17, 4  ;;  %s194_s20 = int_to_ptr.vmem [resolvable:$true] %s193_s20  ;;  %s192_s27 = int_to_ptr.hbm [resolvable:$true] %s191_s27 }
  0x29   : > { %s180_s26 = scalar_lea.sflag [#allocation8], %s158_s11  ;;  %202 = sbr.rel (%p199_p3) target bundleno = 618 (0x26a), region = 32 }
  0x2a   : > { %s168_s25 = scalar_lea.hbm %s1083_s1, %s508_s6 }
  0x2b   : > { %s170_s9 = sshll.u32 %s168_s25, 4  ;;  %s204_s25 = sand.u32 (!%p199_p3), 1, %s802_s16   ;;  %s171_s9 = int_to_ptr.hbm [resolvable:$true] %s170_s9 }
  0x2c   : > { %535 = dma.hbm_to_vmem [thread:$0]  (!%p952_p4), %s171_s9, 64, %s173_s5, %s159_s21  }
  0x2d   : > { %538 = dma.hbm_to_vmem [thread:$0]  (!%p952_p4), %s192_s27, 64, %s194_s20, %s180_s26  }
  0x2e   : > { %s512_s24 = sshll.u32 %s204_s25, 2  ;;  %s205_s1 = scalar_lea.sflag [#allocation5], %s204_s25 }
  0x2f   : > { %s208_s21 = scalar_lea.vmem [#allocation4], %s512_s24 }
  0x30   : > { %773 = dma.done.wait (%p923_p7), %s205_s1, 64  }
  0x31   : > { %775 = vsyncadd (%p923_p7), %s205_s1, 4294967232  ;;  %s215_s9 = scalar_lea.sflag [#allocation8], %s204_s25  ;;  %s218_s17 = scalar_lea.vmem [#allocation7], %s512_s24 }
  0x32   : > { %777 = dma.done.wait (%p923_p7), %s215_s9, 64  }
  0x33   : > { %779 = vsyncadd (%p923_p7), %s215_s9, 4294967232  ;;  %s244_s20 = sand.u32 1, %s790_s13   ;;  %p514_p8 = scmp.ne.s32.totalorder %s810_s18, 0 }
  0x34   : > { %s981_s11 = scalar_lea.vmem [#allocation9], %s244_s20 }
  0x35   : > { %249 = sbr.rel (%p514_p8) target bundleno = 61 (0x3d), region = 44 }
  0x3a   : > { %vm250_vm0 = vcmask 3072   ;;  %v828_v0 = vmov 0.0  }
  0x3b   : > { %251 = vst.msk [vmem:[#allocation2] sm:$0xf] %vm250_vm0, %v828_v0 }
  0x3c   : > { %252 = vst.msk [vmem:[#allocation3] sm:$0xf] %vm250_vm0, %v828_v0 }
  0x3d PF: > { %v253_v1 = vld [vmem:[%s208_s21] sm:$0xf]  ;;  %v984_v2 = vld [vmem:[%s218_s17] sm:$0xf]  ;;  %vm255_vm1 = vcmask 1043456   ;;  %p515_p7 = scmp.ge.s32.totalorder %s810_s18, 2 }
  0x3e   : > { %v256_v3 = vsel %vm255_vm1, %v253_v1, -inf }
  0x3f   : > { %v257_v4 = vrot.slane %v256_v3, 4 }
  0x41   : > { %v258_v5 = vmax.f32 %v256_v3, %v257_v4 }
  0x43   : > { %v259_v6 = vrot.slane %v258_v5, 2 }
  0x45   : > { %v260_v7 = vmax.f32 %v258_v5, %v259_v6 }
  0x47   : > { %v261_v8 = vrot.slane %v260_v7, 1 }
  0x49   : > { %v262_v9 = vmax.f32 %v260_v7, %v261_v8 }
  0x4b   : > { %v263_v10 = vsub.f32 %v253_v1, %v262_v9 }
  0x4d   : > { %v264_v11 = vmul.f32 1.442695, %v263_v10 }
  0x4f   : > { %634 = vpow2.f32 %v264_v11 }
  0x55   : > { %v635_v12 = vpop.eup %634 }
  0x56   : > { %v266_v13 = vsel %vm255_vm1, %v635_v12, 0.0 }
  0x57   : > { %v267_v14 = vrot.slane %v266_v13, 4 }
  0x59   : > { %v268_v15 = vadd.f32 %v267_v14, %v266_v13 }
  0x5b   : > { %v269_v16 = vrot.slane %v268_v15, 2 }
  0x5d   : > { %v270_v17 = vadd.f32 %v269_v16, %v268_v15 }
  0x5f   : > { %v271_v18 = vrot.slane %v270_v17, 1 }
  0x61   : > { %v272_v19 = vadd.f32 %v271_v18, %v270_v17 }
  0x63   : > { %636 = vrcp.f32 %v272_v19  ;;  %v284_v22 = vand.u32 2147483648, %v272_v19  ;;  %vm278_vm2 = vweird.f32 %v272_v19  ;;  %v282_v24 = vand.u32 2147483647, %v272_v19 }
  0x65   : > { %v285_v26 = vor.u32 1.1754944e-38, %v284_v22  ;;  %vm283_vm5 = vcmp.eq.f32.partialorder %v282_v24, 8.507059e+37 }
  0x69   : > { %v637_v20 = vpop.eup %636 }
  0x6a   : > { %v274_v21 = vmul.f32 %v637_v20, %v272_v19  ;;  %vm279_vm3 = vweird.f32 %v637_v20 }
  0x6b   : > { %vm280_vm4 = vmor %vm278_vm2, %vm279_vm3 }
  0x6c   : > { %v275_v23 = vsub.f32 1.0, %v274_v21 }
  0x6e   : > { %v276_v25 = vmul.f32 %v637_v20, %v275_v23 }
  0x70   : > { %v277_v27 = vadd.f32 %v637_v20, %v276_v25  ;;  %291 = sbr.rel (%p515_p7) target bundleno = 248 (0xf8), region = 48 }
  0x72   : > { %v281_v28 = vsel %vm280_vm4, %v637_v20, %v277_v27 }
  0x73   : > { %v286_v29 = vsel %vm283_vm5, %v285_v26, %v281_v28 }
  0x74   : > { %v287_v30 = vmul.f32 %v635_v12, %v286_v29 }
  0x75   : > { %v304_v34 = vsel %vm255_vm1, %v984_v2, 0.0  ;;  %v292_v36 = vld [vmem:[#allocation2] sm:$0xf]  ;;  %vm298_vm6 = vcmask 3072   ;;  %v300_v40 = vld [vmem:[#allocation3] sm:$0xf] }
  0x76   : > { %v301_v31 = vsel %vm255_vm1, %v287_v30, 0.0  ;;  %v293_v32 = vmul.f32 %v287_v30, %v984_v2 }
  0x77   : > { %302 = vadd.xlane.f32.xlu0 %v301_v31 }
  0x78   : > { %v294_v33 = vsel %vm255_vm1, %v293_v32, 0.0 }
  0x79   : > { %295 = vadd.xlane.f32.xlu1 %v294_v33 }
  0x7f   : > { %305 = vadd.xlane.f32.xlu0 %v304_v34 }
  0xea   : > { %v303_v35 = vpop.xlane.xlu0 %302 }
  0xec   : > { %v296_v37 = vpop.xlane.xlu1 %295 }
  0xed   : > { %v297_v38 = vadd.f32 %v296_v37, %v292_v36 }
  0xef   : > { %299 = vst.msk [vmem:[#allocation2] sm:$0xf] %vm298_vm6, %v297_v38 }
  0xf2   : > { %v306_v39 = vpop.xlane.xlu0 %305 }
  0xf3   : > { %v307_v41 = vadd.f32 %v306_v39, %v303_v35 }
  0xf5   : > { %v308_v42 = vadd.f32 %v307_v41, %v300_v40 }
  0xf7   : > { %309 = vst.msk [vmem:[#allocation3] sm:$0xf] %vm298_vm6, %v308_v42 }
  0xf8 PF: > { %p516_p9 = scmp.ne.s32.totalorder %s810_s18, 2 }
  0xf9   : > { %s517_s1 = sshll.u32 (!%p516_p9), %s810_s18, 7 }
  0xfa   : > { %313 = sbr.rel (%p516_p9) target bundleno = 604 (0x25c), region = 52  ;;  %s315_s4 = ssub.s32 (!%p516_p9), 288, %s517_s1 }
  0xff   : > { %v316_v43 = vlaneseq  ;;  %v318_v45 = vstv %s315_s4  ;;  %v322_v53 = vld [vmem:[#allocation2] sm:$0xf]  ;;  %vm328_vm8 = vcmask 3072   ;;  %v330_v56 = vld [vmem:[#allocation3] sm:$0xf] }
 0x100   : > { %v340_v59 = vld [vmem:[%s1062_s0] sm:$0xf] }
 0x101   : > { %v317_v44 = vand.u32 127, %v316_v43 }
 0x103   : > { %vm319_vm7 = vcmp.lt.s32.totalorder %v317_v44, %v318_v45 }
 0x104   : > { %v320_v46 = vsel %vm319_vm7, %v287_v30, 0.0  ;;  %v321_v47 = vsel %vm319_vm7, %v984_v2, 0.0 }
 0x105   : > { %v331_v48 = vsel %vm255_vm1, %v320_v46, 0.0  ;;  %v323_v49 = vmul.f32 %v321_v47, %v320_v46  ;;  %v334_v51 = vsel %vm255_vm1, %v321_v47, 0.0 }
 0x106   : > { %332 = vadd.xlane.f32.xlu0 %v331_v48 }
 0x107   : > { %v324_v50 = vsel %vm255_vm1, %v323_v49, 0.0 }
 0x108   : > { %325 = vadd.xlane.f32.xlu1 %v324_v50 }
 0x10e   : > { %335 = vadd.xlane.f32.xlu0 %v334_v51 }
 0x179   : > { %v333_v52 = vpop.xlane.xlu0 %332 }
 0x17b   : > { %v326_v54 = vpop.xlane.xlu1 %325 }
 0x17c   : > { %v327_v55 = vadd.f32 %v326_v54, %v322_v53 }
 0x17e   : > { %329 = vst.msk [vmem:[#allocation2] sm:$0xf] %vm328_vm8, %v327_v55 }
 0x181   : > { %v336_v57 = vpop.xlane.xlu0 %335 }
 0x182   : > { %v337_v58 = vadd.f32 %v336_v57, %v333_v52 }
 0x184   : > { %v338_v60 = vadd.f32 %v337_v58, %v330_v56 }
 0x185   : > { %v341_v61 = vld [vmem:[#allocation2] sm:$0xf] }
 0x186   : > { %339 = vst.msk [vmem:[#allocation3] sm:$0xf] %vm328_vm8, %v338_v60  ;;  %v342_v62 = vmul.f32 %v341_v61, %v340_v59 }
 0x188   : > { %v343_v63 = vsel %vm328_vm8, %v342_v62, 0.0 }
 0x189   : > { %344 = vadd.xlane.f32.xlu1 %v343_v63 }
 0x18d   : > { %v354_v0 = vld [vmem:[#allocation3] sm:$0xf] }
 0x18e   : > { %v355_v1 = vmul.f32 %v354_v0, %v340_v59 }
 0x190   : > { %v356_v2 = vsel %vm328_vm8, %v355_v1, 0.0 }
 0x191   : > { %357 = vadd.xlane.f32.xlu2 %v356_v2 }
 0x1fc   : > { %v345_v3 = vpop.xlane.xlu1 %344 }
 0x1fd   : > { %v346_v4 = vrot.slane %v345_v3, 4 }
 0x1ff   : > { %v347_v5 = vadd.f32 %v346_v4, %v345_v3 }
 0x201   : > { %v348_v6 = vrot.slane %v347_v5, 2 }
 0x203   : > { %v349_v7 = vadd.f32 %v348_v6, %v347_v5 }
 0x204   : > { %v358_v8 = vpop.xlane.xlu2 %357 }
 0x205   : > { %v359_v9 = vrot.slane %v358_v8, 4  ;;  %v350_v10 = vrot.slane %v349_v7, 1 }
 0x207   : > { %v360_v11 = vadd.f32 %v359_v9, %v358_v8  ;;  %v351_v12 = vadd.f32 %v350_v10, %v349_v7 }
 0x209   : > { %v361_v13 = vrot.slane %v360_v11, 2  ;;  %522 = vpush %v351_v12 }
 0x20b   : > { %v362_v14 = vadd.f32 %v361_v13, %v360_v11 }
 0x20d   : > { %v363_v15 = vrot.slane %v362_v14, 1 }
 0x20f   : > { %v364_v16 = vadd.f32 %v363_v15, %v362_v14 }
 0x211   : > { %524 = vpush %v364_v16 }
 0x23a   : > { %s523_s5 = spop %522 }
 0x23b   : > { %v353_v25 = vstv %s523_s5 }
 0x23c   : > { %v367_v28 = vmul.f32 2.0, %v353_v25 }
 0x242   : > { %s525_s30 = spop %524 }
 0x243   : > { %v366_v17 = vstv %s525_s30 }
 0x244   : > { %v368_v18 = vadd.f32 1.0, %v366_v17 }
 0x246   : > { %638 = vrcp.f32 %v368_v18  ;;  %v380_v22 = vand.u32 2147483648, %v368_v18  ;;  %v378_v24 = vand.u32 2147483647, %v368_v18  ;;  %vm374_vm10 = vweird.f32 %v368_v18 }
 0x248   : > { %v381_v27 = vor.u32 1.1754944e-38, %v380_v22  ;;  %vm379_vm12 = vcmp.eq.f32.partialorder %v378_v24, 8.507059e+37 }
 0x24c   : > { %v639_v19 = vpop.eup %638 }
 0x24d   : > { %v370_v20 = vmul.f32 %v639_v19, %v368_v18  ;;  %vm375_vm9 = vweird.f32 %v639_v19 }
 0x24e   : > { %vm376_vm11 = vmor %vm374_vm10, %vm375_vm9 }
 0x24f   : > { %v371_v21 = vsub.f32 1.0, %v370_v20 }
 0x251   : > { %v372_v23 = vmul.f32 %v639_v19, %v371_v21 }
 0x253   : > { %v373_v26 = vadd.f32 %v639_v19, %v372_v23 }
 0x255   : > { %v377_v29 = vsel %vm376_vm11, %v639_v19, %v373_v26 }
 0x256   : > { %v382_v30 = vsel %vm379_vm12, %v381_v27, %v377_v29 }
 0x257   : > { %v383_v31 = vmul.f32 %v382_v30, %v367_v28 }
 0x259   : > { %v384_v32 = vsub.f32 1.0, %v383_v31 }
 0x25b   : > { %385 = vst [vmem:[%s981_s11] sm:$0x1] %v384_v32 }
 0x25c PF: > { %s395_s28 = scalar_lea.hbm %s1065_s3, %s814_s19  ;;  %s397_s23 = sshll.u32 %s981_s11, 4  ;;  %s398_s23 = int_to_ptr.vmem [resolvable:$true] %s397_s23 }
 0x25d   : > { %s399_s27 = sshll.u32 %s395_s28, 4  ;;  %s387_s26 = scalar_lea.sflag [#allocation6], %s244_s20  ;;  %s400_s27 = int_to_ptr.hbm [resolvable:$true] %s399_s27 }
 0x25e   : > { %s714_s25 = sshra.s32 %s400_s27, 4  ;;  %s720_s17 = scalar_lea.hbm %s1065_s3, 2  ;;  %s715_s25 = int_to_ptr.hbm [resolvable:$true] %s714_s25 }
 0x25f   : > { %s716_s24 = scalar_lea.hbm %s715_s25, 1  ;;  %p721_p0 = scmp.lt.s32.totalorder %s715_s25, %s1065_s3 }
 0x260   : > { %p717_p10 = scmp.ne.s32.totalorder %s715_s25, %s716_s24  ;;  %p722_p1 = scmp.lt.s32.totalorder %s720_s17, %s716_s24 }
 0x262   : > { %p718_p11 = pnand %p717_p10, %p931_p12  ;;  %p723_p4 = por %p722_p1, %p721_p0 }
 0x264   : > { %p719_p13 = pneg %p718_p11 }
 0x266   : > { %p724_p5 = pnand %p723_p4, %p719_p13 }
 0x268   : > { %727 = shalt.err (!%p724_p5)
}
 0x269   : > { %530 = dma.vmem_to_hbm [thread:$0]  (%p931_p12), %s398_s23, 16, %s400_s27, %s387_s26  }
 0x26a PF: > { %p544_p6 = scmp.ge.s32.totalorder %s826_s22, 2  ;;  %s411_s19 = sand.u32 1, %s786_s12  }
 0x26b   : > { %s412_s20 = scalar_lea.sflag [#allocation6], %s411_s19 }
 0x26c   : > { %p540_p3 = pnand %p544_p6, %p944_p2 }
 0x26e   : > { %p541_p8 = pneg %p540_p3 }
 0x270   : > { %781 = dma.done.wait (%p541_p8), %s412_s20, 16  }
 0x271   : > { %783 = vsyncadd (%p541_p8), %s412_s20, 4294967280  ;;  %s22_s22 = sadd.s32 1, %s826_s22   ;;  %s1084_s7 = sld [smem:[#allocation13_spill]] }
 0x272   : > { %p19_p7 = scmp.ge.s32.totalorder %s22_s22, 8   ;;  %s1085_s17 = sld [smem:[#allocation18_spill]] }
 0x273   : > { %s1086_s18 = sld [smem:[#allocation14_spill]]  ;;  %s1090_s12 = smov %s790_s13 }
 0x274   : > { %s1087_s19 = sld [smem:[#allocation15_spill]]  ;;  %s1091_s13 = smov %s794_s14 }
 0x275   : > { %s1088_s20 = sld [smem:[#allocation16_spill]]  ;;  %s1092_s14 = smov %s936_s8 }
 0x276   : > { %s1089_s21 = sld [smem:[#allocation17_spill]]  ;;  %s1093_s15 = smov %s802_s16 }
 0x277   : > { %s1094_s16 = smov %s1084_s7  ;;  %21 = sbr.rel (!%p19_p7) target bundleno = 13 (0xd), region = 102 }
 0x27c   :  { %417 = vsyncpa [#allocation5], 1 }
 0x27d   :  { %419 = vsyncpa [#allocation5 + $0x1], 1 }
 0x27e   :  { %420 = vsyncpa [#allocation8], 1 }
 0x27f   :  { %422 = vsyncpa [#allocation8 + $0x1], 1 }
 0x280   :  { %423 = vsyncpa [#allocation6], 1 }
 0x281   :  { %425 = vsyncpa [#allocation6 + $0x1], 1 }

</bundles_post_ra>
